<compile_context>
chip_gen: v7x
topology: tpu7x:2x2x1
jax: 0.10.0
libtpu: 0.0.40
codegen_flags: <defaults>
</compile_context>

<pallas_src>
import functools

import numpy as np
import jax
import jax.numpy as jnp
from jax.experimental import pallas as pl
from jax.experimental.pallas import tpu as pltpu

_MIB = 1024 * 1024
_BUFFERED_OK = [True]   # flipped to False if pl.Buffered(1) is rejected once


# ----------------------------------------------------------------------------- helpers

def _make_col_matrix(W, k2, pad_l, out_w, apply_pad, scale, g, dtype):
    """Block-diagonal (g*W, g*out_w) matrix: per-image k2-wide column window
    sums + column replicate pad (+ scale), with g images packed along lanes."""
    Wo = W - k2 + 1
    if apply_pad:
        p = np.clip(np.arange(out_w) - pad_l, 0, Wo - 1)
    else:
        p = np.arange(out_w)
    rows = np.arange(W)[:, None]
    blk = ((rows >= p[None, :]) & (rows < p[None, :] + k2)).astype(np.float32) * scale
    if g == 1:
        mat = blk
    else:
        mat = np.zeros((g * W, g * out_w), np.float32)
        for i in range(g):
            mat[i * W:(i + 1) * W, i * out_w:(i + 1) * out_w] = blk
    return jnp.asarray(mat, dtype=dtype)


def _row_window_sum(y, k1, valid_h):
    """v[:, i, :] = sum_{d<k1} y[:, i+d, :] using binary-doubling shift-adds
    (~log2(k1) + popcount(k1) - 1 adds; at most ~3 live temporaries)."""
    if k1 == 1:
        return y[:, :valid_h, :]
    acc = None
    covered = 0
    win = y            # running window of width w; valid starts: shape[1]-w+1
    w = 1
    while covered < k1:
        if k1 & w:
            piece = win[:, covered:covered + valid_h, :]
            acc = piece if acc is None else acc + piece
            covered += w
            if covered >= k1:
                break
        nlen = win.shape[1] - w
        win = win[:, :nlen, :] + win[:, w:w + nlen, :]
        w *= 2
    return acc


def _tpu_hw_info():
    """Best-effort (physical VMEM bytes per TensorCore, TensorCores/device)."""
    kind = ""
    try:
        kind = (jax.devices()[0].device_kind or "").lower()
    except Exception:
        pass
    phys = None
    try:
        phys = int(pltpu.get_tpu_info().vmem_capacity_bytes)
    except Exception:
        phys = None
    if phys is None or phys <= 0:
        phys = 64 * _MIB                    # conservative (v7x-sized) default
    if ("v7" in kind) or ("7x" in kind):    # v7x: 64 MiB/core, 2 TCs per chip
        phys = min(phys, 64 * _MIB)
        num_tc = 2
    elif ("v4" in kind) or ("v5p" in kind) or ("v5 p" in kind):
        num_tc = 2                          # megacore: 'parallel' shards 2 TCs
    else:
        num_tc = 1                          # v5e / v6e: single TensorCore
    return phys, num_tc


def _choose_tiling(ncg, Hp, lin, out_h, lout, x_itemsize, b_bytes, num_tc, phys_vmem):
    """Pick (block rows per step, step count, scoped-VMEM limit)."""
    # Per block-row VMEM: double-buffered input + output blocks plus ~4 live
    # f32 intermediates (column-matmul result + doubling-window temporaries).
    per_row = (2 * Hp * lin + 2 * out_h * lout) * x_itemsize + 4 * Hp * lout * 4
    b_cost = 2 * b_bytes                    # conservative: 2 copies of B
    # 128 MiB parts (v5e/v6e) -> ~96 MiB scoped limit; 64 MiB parts (v7x) keep
    # ~32 MiB; never below what one block row + B needs (clamped to physical).
    base = 96 * _MIB if phys_vmem >= 96 * _MIB else 32 * _MIB
    need_one = per_row + b_cost + 2 * _MIB
    vmem_limit = min(max(base, need_one), max(32 * _MIB, phys_vmem - 8 * _MIB))
    budget = max(per_row, vmem_limit - 8 * _MIB - b_cost)
    tb = int(max(1, min(ncg, budget // per_row)))
    steps = -(-ncg // tb)
    # Two-TensorCore chips: keep the step count even so both cores get the same
    # number of 'parallel' blocks; single-TC chips keep the minimum step count.
    if num_tc >= 2 and ncg >= 2 and steps % 2 == 1:
        steps += 1
    tb = -(-ncg // steps)                   # re-balance -> minimal padded tail
    return int(tb), int(steps), int(vmem_limit)


# ----------------------------------------------------------------------------- kernel

def _box_pool_kernel(x_ref, b_ref, o_ref, *, k1, valid_h, pad_top, post_scale):
    tb, hp, lin = x_ref.shape
    out_h, lout = o_ref.shape[1], o_ref.shape[2]
    pad_bot = out_h - pad_top - valid_h

    # Column stage: one MXU matmul over the whole (tb*hp, lin) slab.  The
    # k2-wide window sum, column replicate pad, lane packing (block-diagonal B)
    # and — for f32 inputs — the 1/(k1*k2) scale are all baked into B.
    x2 = x_ref[...].reshape(tb * hp, lin)
    y = jnp.dot(x2, b_ref[...], preferred_element_type=jnp.float32)
    y = y.reshape(tb, hp, lout)

    # Row stage: k1-wide window sum with O(log k1) shift-adds.
    v = _row_window_sum(y, k1, valid_h)
    if post_scale is not None:
        v = v * post_scale
    v = v.astype(o_ref.dtype)

    # Row replicate pad via static slice stores (edge rows broadcast).
    o_ref[:, pad_top:pad_top + valid_h, :] = v
    if pad_top > 0:
        o_ref[:, 0:pad_top, :] = jnp.broadcast_to(v[:, 0:1, :], (tb, pad_top, lout))
    if pad_bot > 0:
        o_ref[:, pad_top + valid_h:out_h, :] = jnp.broadcast_to(
            v[:, valid_h - 1:valid_h, :], (tb, pad_bot, lout))


# ----------------------------------------------------------------------------- module

class AvgPool2d:
    """JAX/Pallas port of the custom AvgPool2d (default fast_imp=False path)."""

    def __init__(self, kernel_size=None, base_size=None, auto_pad=True,
                 fast_imp=False, train_size=None):
        if kernel_size is None and base_size is None:
            raise ValueError("Either kernel_size or base_size must be provided.")
        self.kernel_size = kernel_size
        self.base_size = base_size
        self.auto_pad = auto_pad
        self.fast_imp = fast_imp
        self.train_size = train_size
        self.rs = [5, 4, 3, 2, 1]

    def _resolve_kernel_size(self, H, W):
        ks = self.kernel_size
        if ks is None and self.base_size is not None and self.train_size is not None:
            base = self.base_size if isinstance(self.base_size, (tuple, list)) \
                else (self.base_size, self.base_size)
            th, tw = self.train_size[-2:]
            # Computed per call (NOT cached on self): fixes the original module's
            # stale kernel_size when inputs of different resolution are seen.
            ks = (max(1, H * base[0] // th), max(1, W * base[1] // tw))
        if ks is None:
            raise RuntimeError("kernel_size was not set and could not be calculated.")
        if isinstance(ks, int):
            ks = (ks, ks)
        return int(ks[0]), int(ks[1])

    def __call__(self, x):
        N, C, H, W = x.shape
        k1, k2 = self._resolve_kernel_size(H, W)

        if k1 >= H and k2 >= W:
            # adaptive_avg_pool2d(x, 1) branch — plain-JAX glue.
            return jnp.mean(x, axis=(2, 3), keepdims=True).astype(x.dtype)

        # TODO(synk): fast_imp strided-cumsum + nearest-interpolate path is not
        # implemented; the default (fast_imp=False) stride-1 box filter follows.

        Ho, Wo = H - k1 + 1, W - k2 + 1
        if Ho < 1 or Wo < 1:
            raise ValueError("kernel_size may not exceed the input size in only one dim.")
        if self.auto_pad:
            pad_t, pad_l = (H - Ho) // 2, (W - Wo) // 2
            out_h, out_w = H, W
        else:
            pad_t = pad_l = 0
            out_h, out_w = Ho, Wo

        # MXU operand dtype: bf16 operands stay bf16 (f32 accumulation); other
        # dtypes use f32 window matrices with 1/(k1*k2) folded into B.
        if x.dtype == jnp.bfloat16:
            mat_dtype, mat_itemsize, fold_scale = jnp.bfloat16, 2, False
        else:
            mat_dtype, mat_itemsize, fold_scale = jnp.float32, 4, True
        inv_area = 1.0 / float(k1 * k2)
        post_scale = None if fold_scale else inv_area

        nc = N * C
        # Lane packing: g images side-by-side on the 128-lane axis (lane-dense
        # vregs / output stores, better MXU N-fill); g balanced against nc so
        # zero-padded pack slots are minimal.
        g_max = min(max(1, 128 // W), nc)
        ncg = -(-nc // g_max)
        g = -(-nc // ncg)
        lin, lout = g * W, g * out_w

        itemsize = x.dtype.itemsize
        sublane = 8 * max(1, 4 // itemsize)
        Hp = -(-H // sublane) * sublane   # row-pad so the in-kernel reshape is free

        B = _make_col_matrix(W, k2, pad_l, out_w, self.auto_pad,
                             inv_area if fold_scale else 1.0, g, mat_dtype)

        # Build the packed (ncg, Hp, g*W) slab (wrapper-side layout plumbing;
        # free reshape when g == 1).
        xf = x.reshape(nc, H, W)
        if g > 1:
            if ncg * g != nc:
                xf = jnp.pad(xf, ((0, ncg * g - nc), (0, 0), (0, 0)))
            xf = xf.reshape(ncg, g, H, W).transpose(0, 2, 1, 3).reshape(ncg, H, lin)
        if Hp != H:
            xf = jnp.pad(xf, ((0, 0), (0, Hp - H), (0, 0)))

        phys_vmem, num_tc = _tpu_hw_info()
        b_bytes = lin * lout * mat_itemsize
        tb, steps, vmem_limit = _choose_tiling(
            ncg, Hp, lin, out_h, lout, itemsize, b_bytes, num_tc, phys_vmem)
        ncg_pad = tb * steps
        if ncg_pad != ncg:
            xf = jnp.pad(xf, ((0, ncg_pad - ncg), (0, 0), (0, 0)))

        kern = functools.partial(_box_pool_kernel, k1=k1, valid_h=Ho,
                                 pad_top=pad_t, post_scale=post_scale)

        def run(single_buffer_b):
            x_spec = pl.BlockSpec((tb, Hp, lin), lambda i: (i, 0, 0))
            o_spec = pl.BlockSpec((tb, out_h, lout), lambda i: (i, 0, 0))
            if single_buffer_b:
                # B is grid-invariant: a single VMEM copy is enough.
                b_spec = pl.BlockSpec((lin, lout), lambda i: (0, 0),
                                      pipeline_mode=pl.Buffered(1))
            else:
                b_spec = pl.BlockSpec((lin, lout), lambda i: (0, 0))
            return pl.pallas_call(
                kern,
                out_shape=jax.ShapeDtypeStruct((ncg_pad, out_h, lout), x.dtype),
                grid_spec=pltpu.PrefetchScalarGridSpec(
                    num_scalar_prefetch=0,
                    grid=(steps,),
                    in_specs=[x_spec, b_spec],
                    out_specs=o_spec),
                compiler_params=pltpu.CompilerParams(
                    dimension_semantics=("parallel",),
                    vmem_limit_bytes=vmem_limit),
            )(xf, B)

        if _BUFFERED_OK[0]:
            try:
                out = run(True)
            except Exception:
                _BUFFERED_OK[0] = False
                out = run(False)
        else:
            out = run(False)

        out = out[:ncg]
        if g > 1:
            out = out.reshape(ncg, out_h, g, out_w).transpose(0, 2, 1, 3)
            out = out.reshape(ncg * g, out_h, out_w)[:nc]
        return out.reshape(N, C, out_h, out_w)


# ----------------------------------------------------------------------------- reference + tests

def _ref_forward(x, kernel_size, auto_pad=True):
    """Pure-JAX reference mirroring the PyTorch cumsum/integral-image code."""
    N, C, H, W = x.shape
    k1, k2 = kernel_size
    if k1 >= H and k2 >= W:
        return jnp.mean(x, axis=(2, 3), keepdims=True)
    s = jnp.cumsum(jnp.cumsum(x, axis=-1), axis=-2)
    s = jnp.pad(s, ((0, 0), (0, 0), (1, 0), (1, 0)))
    s1 = s[:, :, :-k1, :-k2]
    s2 = s[:, :, :-k1, k2:]
    s3 = s[:, :, k1:, :-k2]
    s4 = s[:, :, k1:, k2:]
    out = (s4 + s1 - s2 - s3) / (k1 * k2)
    if auto_pad:
        _h, _w = out.shape[2:]
        pad_t, pad_b = (H - _h) // 2, (H - _h + 1) // 2
        pad_l, pad_r = (W - _w) // 2, (W - _w + 1) // 2
        out = jnp.pad(out, ((0, 0), (0, 0), (pad_t, pad_b), (pad_l, pad_r)),
                      mode='edge')
    return out


if __name__ == "__main__":
    key = jax.random.PRNGKey(0)
    x = jax.random.normal(key, (2, 4, 16, 16), dtype=jnp.float32)

    # auto_pad=True (replicate pad back to input size), lane packing g=8
    pool = AvgPool2d(kernel_size=(5, 4), auto_pad=True)
    out = jax.block_until_ready(pool(x))
    ref = _ref_forward(x, (5, 4), auto_pad=True)
    assert out.shape == ref.shape == x.shape, (out.shape, ref.shape)
    np.testing.assert_allclose(np.asarray(out), np.asarray(ref), rtol=1e-5, atol=1e-5)

    # auto_pad=False ("valid" output)
    pool2 = AvgPool2d(kernel_size=(5, 4), auto_pad=False)
    out2 = jax.block_until_ready(pool2(x))
    ref2 = _ref_forward(x, (5, 4), auto_pad=False)
    np.testing.assert_allclose(np.asarray(out2), np.asarray(ref2), rtol=1e-5, atol=1e-5)

    # odd N*C (balanced lane packing g=3) + different H
    x3 = jax.random.normal(jax.random.PRNGKey(1), (1, 3, 24, 16), dtype=jnp.float32)
    out3 = jax.block_until_ready(AvgPool2d(kernel_size=(3, 5), auto_pad=True)(x3))
    ref3 = _ref_forward(x3, (3, 5), auto_pad=True)
    np.testing.assert_allclose(np.asarray(out3), np.asarray(ref3), rtol=1e-5, atol=1e-5)

    # W > 128 (no lane packing) + H not a sublane multiple (row-padding path)
    x4 = jax.random.normal(jax.random.PRNGKey(2), (2, 3, 20, 136), dtype=jnp.float32)
    out4 = jax.block_until_ready(AvgPool2d(kernel_size=(4, 7), auto_pad=True)(x4))
    ref4 = _ref_forward(x4, (4, 7), auto_pad=True)
    np.testing.assert_allclose(np.asarray(out4), np.asarray(ref4), rtol=1e-5, atol=1e-5)

    # bf16 inputs stay bf16 on the MXU (f32 accumulation)
    xb = x.astype(jnp.bfloat16)
    outb = jax.block_until_ready(AvgPool2d(kernel_size=(5, 4), auto_pad=True)(xb))
    assert outb.dtype == jnp.bfloat16 and outb.shape == x.shape
    np.testing.assert_allclose(np.asarray(outb, dtype=np.float32), np.asarray(ref),
                               rtol=5e-2, atol=5e-2)

    # base_size / train_size path (kernel size derived per call)
    pool5 = AvgPool2d(base_size=(6, 6), train_size=(1, 3, 16, 16), auto_pad=True)
    out5 = jax.block_until_ready(pool5(x))
    ref5 = _ref_forward(x, (6, 6), auto_pad=True)
    np.testing.assert_allclose(np.asarray(out5), np.asarray(ref5), rtol=1e-5, atol=1e-5)

    print("KERNEL_OK")
</pallas_src>

<mosaic_0001>
module attributes {stable_mosaic.version = 11 : i64} {
  func.func @_box_pool_kernel(%arg0: i32, %arg1: memref<1x16x128xf32, #tpu.memory_space<vmem>>, %arg2: memref<128x128xf32, #tpu.memory_space<vmem>>, %arg3: memref<1x16x128xf32, #tpu.memory_space<vmem>>) attributes {dimension_semantics = [#tpu.dimension_semantics<parallel>], iteration_bounds = array<i64: 1>, scalar_prefetch = 0 : i64, scratch_operands = 0 : i64, tpu.core_type = #tpu.core_type<tc>, window_params = [{transform_indices = @transform_0, window_bounds = array<i64: 1, 16, 128>}, {pipeline_mode = #tpu.pipeline_mode<synchronous>, transform_indices = @transform_1, window_bounds = array<i64: 128, 128>}, {transform_indices = @transform_2, window_bounds = array<i64: 1, 16, 128>}]} {
    %c0 = arith.constant 0 : index
    %c0_0 = arith.constant 0 : index
    %c0_1 = arith.constant 0 : index
    %0 = vector.load %arg1[%c0, %c0_0, %c0_1] : memref<1x16x128xf32, #tpu.memory_space<vmem>>, vector<1x16x128xf32>
    %1 = vector.shape_cast %0 : vector<1x16x128xf32> to vector<16x128xf32>
    %c0_2 = arith.constant 0 : index
    %c0_3 = arith.constant 0 : index
    %2 = vector.load %arg2[%c0_2, %c0_3] : memref<128x128xf32, #tpu.memory_space<vmem>>, vector<128x128xf32>
    %cst = arith.constant dense<0.000000e+00> : vector<16x128xf32>
    %3 = tpu.matmul %1, %2, %cst {dimension_numbers = #tpu.dot_dimension_numbers<[1], [0], [0], [1], [0, 0, 1, 1], [], []>} : vector<16x128xf32>, vector<128x128xf32>, vector<16x128xf32> -> vector<16x128xf32>
    %4 = vector.shape_cast %3 : vector<16x128xf32> to vector<1x16x128xf32>
    %5 = vector.extract_strided_slice %4 {offsets = [0, 0, 0], sizes = [1, 12, 128], strides = [1, 1, 1]} : vector<1x16x128xf32> to vector<1x12x128xf32>
    %6 = vector.extract_strided_slice %4 {offsets = [0, 0, 0], sizes = [1, 15, 128], strides = [1, 1, 1]} : vector<1x16x128xf32> to vector<1x15x128xf32>
    %7 = vector.extract_strided_slice %4 {offsets = [0, 1, 0], sizes = [1, 15, 128], strides = [1, 1, 1]} : vector<1x16x128xf32> to vector<1x15x128xf32>
    %8 = arith.addf %6, %7 : vector<1x15x128xf32>
    %9 = vector.extract_strided_slice %8 {offsets = [0, 0, 0], sizes = [1, 13, 128], strides = [1, 1, 1]} : vector<1x15x128xf32> to vector<1x13x128xf32>
    %10 = vector.extract_strided_slice %8 {offsets = [0, 2, 0], sizes = [1, 13, 128], strides = [1, 1, 1]} : vector<1x15x128xf32> to vector<1x13x128xf32>
    %11 = arith.addf %9, %10 : vector<1x13x128xf32>
    %12 = vector.extract_strided_slice %11 {offsets = [0, 1, 0], sizes = [1, 12, 128], strides = [1, 1, 1]} : vector<1x13x128xf32> to vector<1x12x128xf32>
    %13 = arith.addf %5, %12 : vector<1x12x128xf32>
    %c0_4 = arith.constant 0 : index
    %c2 = arith.constant 2 : index
    %c0_5 = arith.constant 0 : index
    %14 = vector.load %arg3[%c0_4, %c2, %c0_5] : memref<1x16x128xf32, #tpu.memory_space<vmem>>, vector<1x12x128xf32>
    tpu.vector_store %arg3[%c0_4, %c2, %c0_5], %13 {strides = array<i32>} : memref<1x16x128xf32, #tpu.memory_space<vmem>>, vector<1x12x128xf32>,
    %15 = vector.extract_strided_slice %13 {offsets = [0, 0, 0], sizes = [1, 1, 128], strides = [1, 1, 1]} : vector<1x12x128xf32> to vector<1x1x128xf32>
    %16 = vector.shape_cast %15 : vector<1x1x128xf32> to vector<1x1x128xf32>
    %17 = vector.broadcast %16 : vector<1x1x128xf32> to vector<1x2x128xf32>
    %c0_6 = arith.constant 0 : index
    %c0_7 = arith.constant 0 : index
    %c0_8 = arith.constant 0 : index
    %18 = vector.load %arg3[%c0_6, %c0_7, %c0_8] : memref<1x16x128xf32, #tpu.memory_space<vmem>>, vector<1x2x128xf32>
    tpu.vector_store %arg3[%c0_6, %c0_7, %c0_8], %17 {strides = array<i32>} : memref<1x16x128xf32, #tpu.memory_space<vmem>>, vector<1x2x128xf32>,
    %19 = vector.extract_strided_slice %13 {offsets = [0, 11, 0], sizes = [1, 1, 128], strides = [1, 1, 1]} : vector<1x12x128xf32> to vector<1x1x128xf32>
    %20 = vector.shape_cast %19 : vector<1x1x128xf32> to vector<1x1x128xf32>
    %21 = vector.broadcast %20 : vector<1x1x128xf32> to vector<1x2x128xf32>
    %c0_9 = arith.constant 0 : index
    %c14 = arith.constant 14 : index
    %c0_10 = arith.constant 0 : index
    %22 = vector.load %arg3[%c0_9, %c14, %c0_10] : memref<1x16x128xf32, #tpu.memory_space<vmem>>, vector<1x2x128xf32>
    tpu.vector_store %arg3[%c0_9, %c14, %c0_10], %21 {strides = array<i32>} : memref<1x16x128xf32, #tpu.memory_space<vmem>>, vector<1x2x128xf32>,
    return
  }
  func.func @transform_0(%arg0: i32) -> (i32, i32, i32) {
    %c0_i32 = arith.constant 0 : i32
    %c0_i32_0 = arith.constant 0 : i32
    %c0_i32_1 = arith.constant 0 : i32
    return %arg0, %c0_i32, %c0_i32_0 : i32, i32, i32
  }
  func.func @transform_1(%arg0: i32) -> (i32, i32) {
    %c0_i32 = arith.constant 0 : i32
    %c0_i32_0 = arith.constant 0 : i32
    %c0_i32_1 = arith.constant 0 : i32
    return %c0_i32, %c0_i32_0 : i32, i32
  }
  func.func @transform_2(%arg0: i32) -> (i32, i32, i32) {
    %c0_i32 = arith.constant 0 : i32
    %c0_i32_0 = arith.constant 0 : i32
    %c0_i32_1 = arith.constant 0 : i32
    return %arg0, %c0_i32, %c0_i32_0 : i32, i32, i32
  }
}

module attributes {stable_mosaic.version = 11 : i64} {
  func.func @_box_pool_kernel(%arg0: i32, %arg1: memref<1x16x128xf32, #tpu.memory_space<vmem>>, %arg2: memref<128x128xf32, #tpu.memory_space<vmem>>, %arg3: memref<1x16x128xf32, #tpu.memory_space<vmem>>) attributes {dimension_semantics = [#tpu.dimension_semantics<parallel>], iteration_bounds = array<i64: 1>, scalar_prefetch = 0 : i64, scratch_operands = 0 : i64, tpu.core_type = #tpu.core_type<tc>, window_params = [{transform_indices = @transform_0, window_bounds = array<i64: 1, 16, 128>}, {pipeline_mode = #tpu.pipeline_mode<synchronous>, transform_indices = @transform_1, window_bounds = array<i64: 128, 128>}, {transform_indices = @transform_2, window_bounds = array<i64: 1, 16, 128>}]} {
    %c0 = arith.constant 0 : index
    %c0_0 = arith.constant 0 : index
    %c0_1 = arith.constant 0 : index
    %0 = vector.load %arg1[%c0, %c0_0, %c0_1] : memref<1x16x128xf32, #tpu.memory_space<vmem>>, vector<1x16x128xf32>
    %1 = vector.shape_cast %0 : vector<1x16x128xf32> to vector<16x128xf32>
    %c0_2 = arith.constant 0 : index
    %c0_3 = arith.constant 0 : index
    %2 = vector.load %arg2[%c0_2, %c0_3] : memref<128x128xf32, #tpu.memory_space<vmem>>, vector<128x128xf32>
    %cst = arith.constant dense<0.000000e+00> : vector<16x128xf32>
    %3 = tpu.matmul %1, %2, %cst {dimension_numbers = #tpu.dot_dimension_numbers<[1], [0], [0], [1], [0, 0, 1, 1], [], []>} : vector<16x128xf32>, vector<128x128xf32>, vector<16x128xf32> -> vector<16x128xf32>
    %4 = vector.shape_cast %3 : vector<16x128xf32> to vector<1x16x128xf32>
    %5 = vector.extract_strided_slice %4 {offsets = [0, 0, 0], sizes = [1, 12, 128], strides = [1, 1, 1]} : vector<1x16x128xf32> to vector<1x12x128xf32>
    %6 = vector.extract_strided_slice %4 {offsets = [0, 0, 0], sizes = [1, 15, 128], strides = [1, 1, 1]} : vector<1x16x128xf32> to vector<1x15x128xf32>
    %7 = vector.extract_strided_slice %4 {offsets = [0, 1, 0], sizes = [1, 15, 128], strides = [1, 1, 1]} : vector<1x16x128xf32> to vector<1x15x128xf32>
    %8 = arith.addf %6, %7 : vector<1x15x128xf32>
    %9 = vector.extract_strided_slice %8 {offsets = [0, 0, 0], sizes = [1, 13, 128], strides = [1, 1, 1]} : vector<1x15x128xf32> to vector<1x13x128xf32>
    %10 = vector.extract_strided_slice %8 {offsets = [0, 2, 0], sizes = [1, 13, 128], strides = [1, 1, 1]} : vector<1x15x128xf32> to vector<1x13x128xf32>
    %11 = arith.addf %9, %10 : vector<1x13x128xf32>
    %12 = vector.extract_strided_slice %11 {offsets = [0, 1, 0], sizes = [1, 12, 128], strides = [1, 1, 1]} : vector<1x13x128xf32> to vector<1x12x128xf32>
    %13 = arith.addf %5, %12 : vector<1x12x128xf32>
    %c0_4 = arith.constant 0 : index
    %c2 = arith.constant 2 : index
    %c0_5 = arith.constant 0 : index
    %14 = vector.load %arg3[%c0_4, %c2, %c0_5] : memref<1x16x128xf32, #tpu.memory_space<vmem>>, vector<1x12x128xf32>
    tpu.vector_store %arg3[%c0_4, %c2, %c0_5], %13 {strides = array<i32>} : memref<1x16x128xf32, #tpu.memory_space<vmem>>, vector<1x12x128xf32>,
    %15 = vector.extract_strided_slice %13 {offsets = [0, 0, 0], sizes = [1, 1, 128], strides = [1, 1, 1]} : vector<1x12x128xf32> to vector<1x1x128xf32>
    %16 = vector.shape_cast %15 : vector<1x1x128xf32> to vector<1x1x128xf32>
    %17 = vector.broadcast %16 : vector<1x1x128xf32> to vector<1x2x128xf32>
    %c0_6 = arith.constant 0 : index
    %c0_7 = arith.constant 0 : index
    %c0_8 = arith.constant 0 : index
    %18 = vector.load %arg3[%c0_6, %c0_7, %c0_8] : memref<1x16x128xf32, #tpu.memory_space<vmem>>, vector<1x2x128xf32>
    tpu.vector_store %arg3[%c0_6, %c0_7, %c0_8], %17 {strides = array<i32>} : memref<1x16x128xf32, #tpu.memory_space<vmem>>, vector<1x2x128xf32>,
    %19 = vector.extract_strided_slice %13 {offsets = [0, 11, 0], sizes = [1, 1, 128], strides = [1, 1, 1]} : vector<1x12x128xf32> to vector<1x1x128xf32>
    %20 = vector.shape_cast %19 : vector<1x1x128xf32> to vector<1x1x128xf32>
    %21 = vector.broadcast %20 : vector<1x1x128xf32> to vector<1x2x128xf32>
    %c0_9 = arith.constant 0 : index
    %c14 = arith.constant 14 : index
    %c0_10 = arith.constant 0 : index
    %22 = vector.load %arg3[%c0_9, %c14, %c0_10] : memref<1x16x128xf32, #tpu.memory_space<vmem>>, vector<1x2x128xf32>
    tpu.vector_store %arg3[%c0_9, %c14, %c0_10], %21 {strides = array<i32>} : memref<1x16x128xf32, #tpu.memory_space<vmem>>, vector<1x2x128xf32>,
    return
  }
  func.func @transform_0(%arg0: i32) -> (i32, i32, i32) {
    %c0_i32 = arith.constant 0 : i32
    %c0_i32_0 = arith.constant 0 : i32
    %c0_i32_1 = arith.constant 0 : i32
    return %arg0, %c0_i32, %c0_i32_0 : i32, i32, i32
  }
  func.func @transform_1(%arg0: i32) -> (i32, i32) {
    %c0_i32 = arith.constant 0 : i32
    %c0_i32_0 = arith.constant 0 : i32
    %c0_i32_1 = arith.constant 0 : i32
    return %c0_i32, %c0_i32_0 : i32, i32
  }
  func.func @transform_2(%arg0: i32) -> (i32, i32, i32) {
    %c0_i32 = arith.constant 0 : i32
    %c0_i32_0 = arith.constant 0 : i32
    %c0_i32_1 = arith.constant 0 : i32
    return %arg0, %c0_i32, %c0_i32_0 : i32, i32, i32
  }
}

</mosaic_0001>

<bundles_post_ra>
// kernel: tpu_custom_call.1
= control target key start
LH: loop header
LB: loop body
LE: loop exit
PB: predicated region body
PF: predicated region fallthrough
CT: control target
= control target key end

     0   :  { %7 = vsyncpa [#allocation3], 0  ;;  %s421_s0 = inlined_call_operand.hbm [shape: f32[1,16,128], index: 0, kind: input, shape index: {}]   ;;  %s422_s1 = inlined_call_operand.hbm [shape: f32[128,128], index: 1, kind: input, shape index: {}]   ;;  %s423_s2 = inlined_call_operand.hbm [shape: f32[1,16,128], index: 2, kind: output, shape index: {}]  }
   0x1   :  { %8 = vsyncpa [#allocation6], 0 }
   0x2   :  { %9 = vsyncpa [#allocation4], 0  ;;  %s354_s9 = smov [#allocation2]   ;;  %s282_s13 = scalar_lea.hbm %s421_s0, 256 }
   0x3   :  { %s15_s10 = sshll.u32 %s354_s9, 4  ;;  %p283_p0 = scmp.ne.s32.totalorder %s421_s0, %s282_s13  ;;  %s16_s10 = int_to_ptr.vmem [resolvable:$true] %s15_s10 }
   0x4   :  { %p286_p1 = scmp.lt.u32.totalorder %s282_s13, %s421_s0 }
   0x6   :  { %p288_p2 = pnand %p286_p1, %p283_p0 }
   0x8   :  { %291 = shalt.err (!%p288_p2)
}
   0x9   :  { %s292_s18 = scalar_lea.vmem %s16_s10, 256  ;;  %p297_p4 = scmp.lt.s32.totalorder %s16_s10, %s16_s10 }
   0xa   :  { %p293_p3 = scmp.ne.s32.totalorder %s16_s10, %s292_s18  ;;  %p298_p5 = scmp.lt.s32.totalorder %s292_s18, %s292_s18 }
   0xc   :  { %p299_p6 = por %p298_p5, %p297_p4 }
   0xe   :  { %p300_p7 = pnand %p299_p6, %p293_p3 }
  0x10   :  { %303 = shalt.err (!%p300_p7)
}
  0x11   :  { %s355_s19 = smov 128   ;;  %s356_s20 = smov 8  }
  0x12   :  { %21 = dma.hbm_to_vmem [thread:$0]  %s421_s0, 256, %s16_s10, [#allocation3], %s355_s19, %s355_s19, %s356_s20  }
  0x13   :  { %s357_s23 = smov [#allocation5]   ;;  %s304_s27 = scalar_lea.hbm %s422_s1, 2048 }
  0x14   :  { %s27_s24 = sshll.u32 %s357_s23, 4  ;;  %p305_p8 = scmp.ne.s32.totalorder %s422_s1, %s304_s27  ;;  %s28_s24 = int_to_ptr.vmem [resolvable:$true] %s27_s24 }
  0x15   :  { %p308_p9 = scmp.lt.u32.totalorder %s304_s27, %s422_s1 }
  0x17   :  { %p310_p10 = pnand %p308_p9, %p305_p8 }
  0x19   :  { %313 = shalt.err (!%p310_p10)
}
  0x1a   :  { %s314_s4 = scalar_lea.vmem %s28_s24, 2048  ;;  %p319_p12 = scmp.lt.s32.totalorder %s28_s24, %s28_s24 }
  0x1b   :  { %p315_p11 = scmp.ne.s32.totalorder %s28_s24, %s314_s4  ;;  %p320_p13 = scmp.lt.s32.totalorder %s314_s4, %s314_s4 }
  0x1d   :  { %p321_p0 = por %p320_p13, %p319_p12 }
  0x1f   :  { %p322_p1 = pnand %p321_p0, %p315_p11 }
  0x21   :  { %325 = shalt.err (!%p322_p1)
}
  0x22   :  { %33 = dma.hbm_to_vmem [thread:$0]  %s422_s1, 2048, %s28_s24, [#allocation6], %s355_s19, %s355_s19, %s356_s20  }
  0x23   :  { %348 = dma.done.wait [#allocation3], 256  }
  0x24   :  { %349 = vsyncadd [#allocation3], 4294967040 }
  0x25   :  { %350 = dma.done.wait [#allocation6], 2048  }
  0x26   :  { %351 = vsyncadd [#allocation6], 4294965248  ;;  %v42_v0 = vld [vmem:[#allocation5] sm:$0xff]  ;;  %v43_v1 = vld [vmem:[#allocation5 + $0x8] sm:$0xff]  ;;  %v164_v28 = vlaneseq  ;;  %vm135_vm0 = vcmask 1046528   ;;  %vm145_vm1 = vcmask 1045504  }
  0x27   :  { %v44_v2 = vld [vmem:[#allocation5 + $0x10] sm:$0xff]  ;;  %v245_v3 = vpack.c.bf16 %v43_v1, %v42_v0  ;;  %v45_v4 = vld [vmem:[#allocation5 + $0x18] sm:$0xff]  ;;  %v46_v6 = vld [vmem:[#allocation5 + $0x20] sm:$0xff]  ;;  %s358_s1 = smov [#allocation7]  }
  0x28   :  { %v249_v5 = vpack.c.bf16 %v45_v4, %v44_v2  ;;  %v47_v7 = vld [vmem:[#allocation5 + $0x28] sm:$0xff]  ;;  %v40_v9 = vld [vmem:[#allocation2] sm:$0xff]  ;;  %v49_v11 = vld [vmem:[#allocation5 + $0x38] sm:$0xff]  ;;  %v165_v34 = vshrl.u32 %v164_v28, 7  ;;  %s179_s6 = sshll.u32 %s358_s1, 4  ;;  %s180_s6 = int_to_ptr.vmem [resolvable:$true] %s179_s6 }
  0x29   :  { %246 = vmatprep.subr.bf16.mxu0 %v245_v3  ;;  %v253_v8 = vpack.c.bf16 %v47_v7, %v46_v6  ;;  %v48_v10 = vld [vmem:[#allocation5 + $0x30] sm:$0xff]  ;;  %242 = vmatprep.mubr.f32.mxu0 %v40_v9  ;;  %v50_v13 = vld [vmem:[#allocation5 + $0x40] sm:$0xff]  ;;  %v51_v14 = vld [vmem:[#allocation5 + $0x48] sm:$0xff]  ;;  %s326_s7 = scalar_lea.vmem %s180_s6, 256  ;;  %p331_p3 = scmp.lt.s32.totalorder %s180_s6, %s180_s6 }
  0x2a   :  { %248 = vmatpush3.bf16.msra.mxu0 %v245_v3  ;;  %v257_v12 = vpack.c.bf16 %v49_v11, %v48_v10  ;;  %v261_v15 = vpack.c.bf16 %v51_v14, %v50_v13  ;;  %v52_v16 = vld [vmem:[#allocation5 + $0x50] sm:$0xff]  ;;  %v53_v17 = vld [vmem:[#allocation5 + $0x58] sm:$0xff]  ;;  %v54_v19 = vld [vmem:[#allocation5 + $0x60] sm:$0xff]  ;;  %v171_v39 = vsub.s32 3, %v165_v34  ;;  %v166_v45 = vsub.s32 0, %v165_v34  ;;  %p327_p2 = scmp.ne.s32.totalorder %s180_s6, %s326_s7  ;;  %p332_p4 = scmp.lt.s32.totalorder %s326_s7, %s326_s7 }
  0x2b   :  { %250 = vmatprep.subr.bf16.mxu0 %v249_v5  ;;  %v265_v18 = vpack.c.bf16 %v53_v17, %v52_v16  ;;  %v55_v20 = vld [vmem:[#allocation5 + $0x68] sm:$0xff]  ;;  %v56_v22 = vld [vmem:[#allocation5 + $0x70] sm:$0xff]  ;;  %v57_v23 = vld [vmem:[#allocation5 + $0x78] sm:$0xff] }
  0x2c   :  { %v269_v21 = vpack.c.bf16 %v55_v20, %v54_v19  ;;  %v273_v24 = vpack.c.bf16 %v57_v23, %v56_v22  ;;  %v41_v25 = vld [vmem:[#allocation2 + $0x8] sm:$0xff]  ;;  %p333_p5 = por %p332_p4, %p331_p3 }
  0x2e   :  { %252 = vmatpush3.bf16.msra.mxu0 %v249_v5  ;;  %p334_p6 = pnand %p333_p5, %p327_p2 }
  0x2f   :  { %254 = vmatprep.subr.bf16.mxu0 %v253_v8 }
  0x32   :  { %256 = vmatpush3.bf16.msra.mxu0 %v253_v8 }
  0x33   :  { %258 = vmatprep.subr.bf16.mxu0 %v257_v12 }
  0x36   :  { %260 = vmatpush3.bf16.msra.mxu0 %v257_v12 }
  0x37   :  { %262 = vmatprep.subr.bf16.mxu0 %v261_v15 }
  0x3a   :  { %264 = vmatpush3.bf16.msra.mxu0 %v261_v15 }
  0x3b   :  { %266 = vmatprep.subr.bf16.mxu0 %v265_v18 }
  0x3e   :  { %268 = vmatpush3.bf16.msra.mxu0 %v265_v18 }
  0x3f   :  { %270 = vmatprep.subr.bf16.mxu0 %v269_v21 }
  0x42   :  { %272 = vmatpush3.bf16.msra.mxu0 %v269_v21 }
  0x43   :  { %274 = vmatprep.subr.bf16.mxu0 %v273_v24 }
  0x46   :  { %276 = vmatpush3.bf16.msra.mxu0 %v273_v24 }
  0x49   :  { %243 = vmatmul.mubr.f32.vlgmr.msra.gmra.mrb[0].mxu0 %v41_v25 }
 0x11c   :  { %v244_v26 = vpop.f32.mrb[0].mxu0 }
 0x11d   :  { %v137_v27 = vrot.slane %v244_v26, 1  ;;  %v124_v29 = vpop.f32.mrb[1].mxu0 }
 0x11e   :  { %v136_v30 = vrot.slane %v124_v29, 1 }
 0x11f   :  { %v142_v31 = vadd.f32 %v244_v26, %v137_v27 }
 0x120   :  { %v138_v32 = vsel %vm135_vm0, %v136_v30, %v137_v27 }
 0x121   :  { %v147_v33 = vrot.slane %v142_v31, 2  ;;  %v141_v35 = vadd.f32 %v138_v32, %v124_v29 }
 0x123   :  { %v152_v36 = vadd.f32 %v147_v33, %v142_v31  ;;  %v146_v37 = vrot.slane %v141_v35, 2 }
 0x125   :  { %v156_v38 = vrot.slane %v152_v36, 1  ;;  %v148_v40 = vsel %vm145_vm1, %v146_v37, %v147_v33 }
 0x126   :  { %v151_v41 = vadd.f32 %v148_v40, %v141_v35 }
 0x127   :  { %v161_v42 = vadd.f32 %v244_v26, %v156_v38 }
 0x128   :  { %v155_v43 = vrot.slane %v151_v41, 1 }
 0x129   :  { %163 = vst [vmem:[#allocation7 + $0xa] sm:$0xf] %v161_v42  ;;  %v172_v44 = vrot.slane %v161_v42, %v171_v39 }
 0x12a   :  { %v157_v46 = vsel %vm135_vm0, %v155_v43, %v156_v38 }
 0x12b   :  { %173 = vst [vmem:[#allocation7 + $0xe] sm:$0x3] %v172_v44  ;;  %v160_v47 = vadd.f32 %v157_v46, %v124_v29 }
 0x12d   :  { %162 = vst [vmem:[#allocation7 + $0x2] sm:$0xff] %v160_v47  ;;  %v167_v48 = vrot.slane %v160_v47, %v166_v45 }
 0x12f   :  { %168 = vst [vmem:[#allocation7] sm:$0x3] %v167_v48 }
 0x130   :  { %337 = shalt.err (!%p334_p6)
}
 0x131   :  { %s338_s10 = scalar_lea.hbm %s423_s2, 256 }
 0x132   :  { %p339_p7 = scmp.ne.s32.totalorder %s423_s2, %s338_s10  ;;  %p342_p8 = scmp.lt.u32.totalorder %s338_s10, %s423_s2 }
 0x134   :  { %p344_p9 = pnand %p342_p8, %p339_p7 }
 0x136   :  { %347 = shalt.err (!%p344_p9)
}
 0x137   :  { %185 = dma.vmem_to_hbm [thread:$0]  %s180_s6, 256, %s423_s2, [#allocation4], %s355_s19, %s355_s19, %s356_s20  }
 0x138   :  { %352 = dma.done.wait [#allocation4], 256  }
 0x139   :  { %353 = vsyncadd [#allocation4], 4294967040 }
 0x13a   :  { %189 = vsyncpa [#allocation3], 1 }
 0x13b   :  { %190 = vsyncpa [#allocation6], 1 }
 0x13c   :  { %191 = vsyncpa [#allocation4], 1 }

// kernel: tpu_custom_call.1
= control target key start
LH: loop header
LB: loop body
LE: loop exit
PB: predicated region body
PF: predicated region fallthrough
CT: control target
= control target key end

     0   :  { %7 = vsyncpa [#allocation3], 0  ;;  %s421_s0 = inlined_call_operand.hbm [shape: f32[1,16,128], index: 0, kind: input, shape index: {}]   ;;  %s422_s1 = inlined_call_operand.hbm [shape: f32[128,128], index: 1, kind: input, shape index: {}]   ;;  %s423_s2 = inlined_call_operand.hbm [shape: f32[1,16,128], index: 2, kind: output, shape index: {}]  }
   0x1   :  { %8 = vsyncpa [#allocation6], 0 }
   0x2   :  { %9 = vsyncpa [#allocation4], 0  ;;  %s354_s9 = smov [#allocation2]   ;;  %s282_s13 = scalar_lea.hbm %s421_s0, 256 }
   0x3   :  { %s15_s10 = sshll.u32 %s354_s9, 4  ;;  %p283_p0 = scmp.ne.s32.totalorder %s421_s0, %s282_s13  ;;  %s16_s10 = int_to_ptr.vmem [resolvable:$true] %s15_s10 }
   0x4   :  { %p286_p1 = scmp.lt.u32.totalorder %s282_s13, %s421_s0 }
   0x6   :  { %p288_p2 = pnand %p286_p1, %p283_p0 }
   0x8   :  { %291 = shalt.err (!%p288_p2)
}
   0x9   :  { %s292_s18 = scalar_lea.vmem %s16_s10, 256  ;;  %p297_p4 = scmp.lt.s32.totalorder %s16_s10, %s16_s10 }
   0xa   :  { %p293_p3 = scmp.ne.s32.totalorder %s16_s10, %s292_s18  ;;  %p298_p5 = scmp.lt.s32.totalorder %s292_s18, %s292_s18 }
   0xc   :  { %p299_p6 = por %p298_p5, %p297_p4 }
   0xe   :  { %p300_p7 = pnand %p299_p6, %p293_p3 }
  0x10   :  { %303 = shalt.err (!%p300_p7)
}
  0x11   :  { %s355_s19 = smov 128   ;;  %s356_s20 = smov 8  }
  0x12   :  { %21 = dma.hbm_to_vmem [thread:$0]  %s421_s0, 256, %s16_s10, [#allocation3], %s355_s19, %s355_s19, %s356_s20  }
  0x13   :  { %s357_s23 = smov [#allocation5]   ;;  %s304_s27 = scalar_lea.hbm %s422_s1, 2048 }
  0x14   :  { %s27_s24 = sshll.u32 %s357_s23, 4  ;;  %p305_p8 = scmp.ne.s32.totalorder %s422_s1, %s304_s27  ;;  %s28_s24 = int_to_ptr.vmem [resolvable:$true] %s27_s24 }
  0x15   :  { %p308_p9 = scmp.lt.u32.totalorder %s304_s27, %s422_s1 }
  0x17   :  { %p310_p10 = pnand %p308_p9, %p305_p8 }
  0x19   :  { %313 = shalt.err (!%p310_p10)
}
  0x1a   :  { %s314_s4 = scalar_lea.vmem %s28_s24, 2048  ;;  %p319_p12 = scmp.lt.s32.totalorder %s28_s24, %s28_s24 }
  0x1b   :  { %p315_p11 = scmp.ne.s32.totalorder %s28_s24, %s314_s4  ;;  %p320_p13 = scmp.lt.s32.totalorder %s314_s4, %s314_s4 }
  0x1d   :  { %p321_p0 = por %p320_p13, %p319_p12 }
  0x1f   :  { %p322_p1 = pnand %p321_p0, %p315_p11 }
  0x21   :  { %325 = shalt.err (!%p322_p1)
}
  0x22   :  { %33 = dma.hbm_to_vmem [thread:$0]  %s422_s1, 2048, %s28_s24, [#allocation6], %s355_s19, %s355_s19, %s356_s20  }
  0x23   :  { %348 = dma.done.wait [#allocation3], 256  }
  0x24   :  { %349 = vsyncadd [#allocation3], 4294967040 }
  0x25   :  { %350 = dma.done.wait [#allocation6], 2048  }
  0x26   :  { %351 = vsyncadd [#allocation6], 4294965248  ;;  %v42_v0 = vld [vmem:[#allocation5] sm:$0xff]  ;;  %v43_v1 = vld [vmem:[#allocation5 + $0x8] sm:$0xff]  ;;  %v164_v28 = vlaneseq  ;;  %vm135_vm0 = vcmask 1046528   ;;  %vm145_vm1 = vcmask 1045504  }
  0x27   :  { %v44_v2 = vld [vmem:[#allocation5 + $0x10] sm:$0xff]  ;;  %v245_v3 = vpack.c.bf16 %v43_v1, %v42_v0  ;;  %v45_v4 = vld [vmem:[#allocation5 + $0x18] sm:$0xff]  ;;  %v46_v6 = vld [vmem:[#allocation5 + $0x20] sm:$0xff]  ;;  %s358_s1 = smov [#allocation7]  }
  0x28   :  { %v249_v5 = vpack.c.bf16 %v45_v4, %v44_v2  ;;  %v47_v7 = vld [vmem:[#allocation5 + $0x28] sm:$0xff]  ;;  %v40_v9 = vld [vmem:[#allocation2] sm:$0xff]  ;;  %v49_v11 = vld [vmem:[#allocation5 + $0x38] sm:$0xff]  ;;  %v165_v34 = vshrl.u32 %v164_v28, 7  ;;  %s179_s6 = sshll.u32 %s358_s1, 4  ;;  %s180_s6 = int_to_ptr.vmem [resolvable:$true] %s179_s6 }
  0x29   :  { %246 = vmatprep.subr.bf16.mxu0 %v245_v3  ;;  %v253_v8 = vpack.c.bf16 %v47_v7, %v46_v6  ;;  %v48_v10 = vld [vmem:[#allocation5 + $0x30] sm:$0xff]  ;;  %242 = vmatprep.mubr.f32.mxu0 %v40_v9  ;;  %v50_v13 = vld [vmem:[#allocation5 + $0x40] sm:$0xff]  ;;  %v51_v14 = vld [vmem:[#allocation5 + $0x48] sm:$0xff]  ;;  %s326_s7 = scalar_lea.vmem %s180_s6, 256  ;;  %p331_p3 = scmp.lt.s32.totalorder %s180_s6, %s180_s6 }
  0x2a   :  { %248 = vmatpush3.bf16.msra.mxu0 %v245_v3  ;;  %v257_v12 = vpack.c.bf16 %v49_v11, %v48_v10  ;;  %v261_v15 = vpack.c.bf16 %v51_v14, %v50_v13  ;;  %v52_v16 = vld [vmem:[#allocation5 + $0x50] sm:$0xff]  ;;  %v53_v17 = vld [vmem:[#allocation5 + $0x58] sm:$0xff]  ;;  %v54_v19 = vld [vmem:[#allocation5 + $0x60] sm:$0xff]  ;;  %v171_v39 = vsub.s32 3, %v165_v34  ;;  %v166_v45 = vsub.s32 0, %v165_v34  ;;  %p327_p2 = scmp.ne.s32.totalorder %s180_s6, %s326_s7  ;;  %p332_p4 = scmp.lt.s32.totalorder %s326_s7, %s326_s7 }
  0x2b   :  { %250 = vmatprep.subr.bf16.mxu0 %v249_v5  ;;  %v265_v18 = vpack.c.bf16 %v53_v17, %v52_v16  ;;  %v55_v20 = vld [vmem:[#allocation5 + $0x68] sm:$0xff]  ;;  %v56_v22 = vld [vmem:[#allocation5 + $0x70] sm:$0xff]  ;;  %v57_v23 = vld [vmem:[#allocation5 + $0x78] sm:$0xff] }
  0x2c   :  { %v269_v21 = vpack.c.bf16 %v55_v20, %v54_v19  ;;  %v273_v24 = vpack.c.bf16 %v57_v23, %v56_v22  ;;  %v41_v25 = vld [vmem:[#allocation2 + $0x8] sm:$0xff]  ;;  %p333_p5 = por %p332_p4, %p331_p3 }
  0x2e   :  { %252 = vmatpush3.bf16.msra.mxu0 %v249_v5  ;;  %p334_p6 = pnand %p333_p5, %p327_p2 }
  0x2f   :  { %254 = vmatprep.subr.bf16.mxu0 %v253_v8 }
  0x32   :  { %256 = vmatpush3.bf16.msra.mxu0 %v253_v8 }
  0x33   :  { %258 = vmatprep.subr.bf16.mxu0 %v257_v12 }
  0x36   :  { %260 = vmatpush3.bf16.msra.mxu0 %v257_v12 }
  0x37   :  { %262 = vmatprep.subr.bf16.mxu0 %v261_v15 }
  0x3a   :  { %264 = vmatpush3.bf16.msra.mxu0 %v261_v15 }
  0x3b   :  { %266 = vmatprep.subr.bf16.mxu0 %v265_v18 }
  0x3e   :  { %268 = vmatpush3.bf16.msra.mxu0 %v265_v18 }
  0x3f   :  { %270 = vmatprep.subr.bf16.mxu0 %v269_v21 }
  0x42   :  { %272 = vmatpush3.bf16.msra.mxu0 %v269_v21 }
  0x43   :  { %274 = vmatprep.subr.bf16.mxu0 %v273_v24 }
  0x46   :  { %276 = vmatpush3.bf16.msra.mxu0 %v273_v24 }
  0x49   :  { %243 = vmatmul.mubr.f32.vlgmr.msra.gmra.mrb[0].mxu0 %v41_v25 }
 0x11c   :  { %v244_v26 = vpop.f32.mrb[0].mxu0 }
 0x11d   :  { %v137_v27 = vrot.slane %v244_v26, 1  ;;  %v124_v29 = vpop.f32.mrb[1].mxu0 }
 0x11e   :  { %v136_v30 = vrot.slane %v124_v29, 1 }
 0x11f   :  { %v142_v31 = vadd.f32 %v244_v26, %v137_v27 }
 0x120   :  { %v138_v32 = vsel %vm135_vm0, %v136_v30, %v137_v27 }
 0x121   :  { %v147_v33 = vrot.slane %v142_v31, 2  ;;  %v141_v35 = vadd.f32 %v138_v32, %v124_v29 }
 0x123   :  { %v152_v36 = vadd.f32 %v147_v33, %v142_v31  ;;  %v146_v37 = vrot.slane %v141_v35, 2 }
 0x125   :  { %v156_v38 = vrot.slane %v152_v36, 1  ;;  %v148_v40 = vsel %vm145_vm1, %v146_v37, %v147_v33 }
 0x126   :  { %v151_v41 = vadd.f32 %v148_v40, %v141_v35 }
 0x127   :  { %v161_v42 = vadd.f32 %v244_v26, %v156_v38 }
 0x128   :  { %v155_v43 = vrot.slane %v151_v41, 1 }
 0x129   :  { %163 = vst [vmem:[#allocation7 + $0xa] sm:$0xf] %v161_v42  ;;  %v172_v44 = vrot.slane %v161_v42, %v171_v39 }
 0x12a   :  { %v157_v46 = vsel %vm135_vm0, %v155_v43, %v156_v38 }
 0x12b   :  { %173 = vst [vmem:[#allocation7 + $0xe] sm:$0x3] %v172_v44  ;;  %v160_v47 = vadd.f32 %v157_v46, %v124_v29 }
 0x12d   :  { %162 = vst [vmem:[#allocation7 + $0x2] sm:$0xff] %v160_v47  ;;  %v167_v48 = vrot.slane %v160_v47, %v166_v45 }
 0x12f   :  { %168 = vst [vmem:[#allocation7] sm:$0x3] %v167_v48 }
 0x130   :  { %337 = shalt.err (!%p334_p6)
}
 0x131   :  { %s338_s10 = scalar_lea.hbm %s423_s2, 256 }
 0x132   :  { %p339_p7 = scmp.ne.s32.totalorder %s423_s2, %s338_s10  ;;  %p342_p8 = scmp.lt.u32.totalorder %s338_s10, %s423_s2 }
 0x134   :  { %p344_p9 = pnand %p342_p8, %p339_p7 }
 0x136   :  { %347 = shalt.err (!%p344_p9)
}
 0x137   :  { %185 = dma.vmem_to_hbm [thread:$0]  %s180_s6, 256, %s423_s2, [#allocation4], %s355_s19, %s355_s19, %s356_s20  }
 0x138   :  { %352 = dma.done.wait [#allocation4], 256  }
 0x139   :  { %353 = vsyncadd [#allocation4], 4294967040 }
 0x13a   :  { %189 = vsyncpa [#allocation3], 1 }
 0x13b   :  { %190 = vsyncpa [#allocation6], 1 }
 0x13c   :  { %191 = vsyncpa [#allocation4], 1 }

</bundles_post_ra>
